<compile_context>
chip_gen: v6e
topology: v6e:2x2x1
jax: 0.10.0
libtpu: 0.0.40
codegen_flags: <defaults>
</compile_context>

<pallas_src>
import jax
import jax.numpy as jnp
from jax import lax
from jax.experimental import pallas as pl
from jax.experimental.pallas import tpu as pltpu

NUM_CLASSES = 964


def _round_up(x, m):
    return ((x + m - 1) // m) * m


def linear_kernel(x_ref, w_ref, o_ref):
    # x_ref : (tm, fc1)        VMEM tile (row tile of the batch)
    # w_ref : (n_pad, fc1)     full (padded) weight, resident across the grid
    # o_ref : (tm, n_pad)      lane-dense output tile (n_pad % 128 == 0)
    #
    # y = x @ W.T  done as dot_general contracting the last dims of both
    # operands — no wrapper-side transpose materialization needed.
    o_ref[...] = lax.dot_general(
        x_ref[...],
        w_ref[...],
        dimension_numbers=(((1,), (1,)), ((), ())),
        preferred_element_type=jnp.float32,
    ).astype(o_ref.dtype)


def classifier_forward(x, w, *, tm=256):
    """y = x @ w.T  (no bias), matching nn.Linear(fc1, num_classes, bias=False).

    x: (B, fc1)   w: (num_classes, fc1)   returns (B, num_classes)
    """
    B, fc1 = x.shape
    num_classes, fc1_w = w.shape
    assert fc1 == fc1_w

    # --- lane-dense output: pad the class dim up to a multiple of 128 ---------
    n_pad = _round_up(num_classes, 128)
    if n_pad != num_classes:
        w = jnp.pad(w, ((0, n_pad - num_classes), (0, 0)))

    # --- row tile: big enough to amortize per-step overhead & fill the MXU,
    #     but don't pad a tiny batch all the way up to 256 rows --------------
    tm = min(tm, _round_up(B, 8))
    b_pad = _round_up(B, tm)
    if b_pad != B:
        x = jnp.pad(x, ((0, b_pad - B), (0, 0)))

    grid = (b_pad // tm,)

    y = pl.pallas_call(
        linear_kernel,
        out_shape=jax.ShapeDtypeStruct((b_pad, n_pad), x.dtype),
        grid_spec=pltpu.PrefetchScalarGridSpec(
            num_scalar_prefetch=0,
            grid=grid,
            in_specs=[
                # streaming row tiles of x
                pl.BlockSpec((tm, fc1), lambda i: (i, 0)),
                # whole (padded) weight, resident across all grid steps
                pl.BlockSpec((n_pad, fc1), lambda i: (0, 0)),
            ],
            out_specs=pl.BlockSpec((tm, n_pad), lambda i: (i, 0)),
        ),
        compiler_params=pltpu.CompilerParams(
            dimension_semantics=("parallel",),     # batch rows split across TCs
            vmem_limit_bytes=64 * 1024 * 1024,     # headroom for large tm on v5e
        ),
    )(x, w)

    # strip batch-tail padding and the 964 -> 1024 class padding
    return y[:B, :num_classes]


if __name__ == "__main__":
    # Small, shape-consistent example: batch=8, fc1=64, num_classes=964
    B, FC1 = 8, 64

    key = jax.random.PRNGKey(0)
    kx, kw = jax.random.split(key)

    x = jax.random.normal(kx, (B, FC1), dtype=jnp.float32)
    # deterministic synthetic weight, same shape convention as nn.Linear: (out, in)
    bound = 1.0 / jnp.sqrt(FC1)
    w = jax.random.uniform(
        kw, (NUM_CLASSES, FC1), dtype=jnp.float32, minval=-bound, maxval=bound
    )

    y = classifier_forward(x, w)
    y = jax.block_until_ready(y)

    # correctness check against plain JAX reference
    y_ref = x @ w.T
    assert y.shape == (B, NUM_CLASSES)
    assert jnp.allclose(y, y_ref, atol=1e-4, rtol=1e-4)

    print("KERNEL_OK")
</pallas_src>

<mosaic_0001>
module attributes {stable_mosaic.version = 11 : i64} {
  func.func @linear_kernel(%arg0: i32, %arg1: memref<8x64xf32, #tpu.memory_space<vmem>>, %arg2: memref<1024x64xf32, #tpu.memory_space<vmem>>, %arg3: memref<8x1024xf32, #tpu.memory_space<vmem>>) attributes {dimension_semantics = [#tpu.dimension_semantics<parallel>], iteration_bounds = array<i64: 1>, scalar_prefetch = 0 : i64, scratch_operands = 0 : i64, tpu.core_type = #tpu.core_type<tc>, window_params = [{transform_indices = @transform_0, window_bounds = array<i64: 8, 64>}, {pipeline_mode = #tpu.pipeline_mode<synchronous>, transform_indices = @transform_1, window_bounds = array<i64: 1024, 64>}, {transform_indices = @transform_2, window_bounds = array<i64: 8, 1024>}]} {
    %c0 = arith.constant 0 : index
    %c0_0 = arith.constant 0 : index
    %0 = vector.load %arg1[%c0, %c0_0] : memref<8x64xf32, #tpu.memory_space<vmem>>, vector<8x64xf32>
    %c0_1 = arith.constant 0 : index
    %c0_2 = arith.constant 0 : index
    %1 = vector.load %arg2[%c0_1, %c0_2] : memref<1024x64xf32, #tpu.memory_space<vmem>>, vector<1024x64xf32>
    %cst = arith.constant dense<0.000000e+00> : vector<8x1024xf32>
    %2 = tpu.matmul %0, %1, %cst {dimension_numbers = #tpu.dot_dimension_numbers<[1], [1], [0], [0], [0, 0, 1, 0], [], []>} : vector<8x64xf32>, vector<1024x64xf32>, vector<8x1024xf32> -> vector<8x1024xf32>
    %c0_3 = arith.constant 0 : index
    %c0_4 = arith.constant 0 : index
    %3 = vector.load %arg3[%c0_3, %c0_4] : memref<8x1024xf32, #tpu.memory_space<vmem>>, vector<8x1024xf32>
    tpu.vector_store %arg3[%c0_3, %c0_4], %2 {strides = array<i32>} : memref<8x1024xf32, #tpu.memory_space<vmem>>, vector<8x1024xf32>,
    return
  }
  func.func @transform_0(%arg0: i32) -> (i32, i32) {
    %c0_i32 = arith.constant 0 : i32
    %c0_i32_0 = arith.constant 0 : i32
    return %arg0, %c0_i32 : i32, i32
  }
  func.func @transform_1(%arg0: i32) -> (i32, i32) {
    %c0_i32 = arith.constant 0 : i32
    %c0_i32_0 = arith.constant 0 : i32
    %c0_i32_1 = arith.constant 0 : i32
    return %c0_i32, %c0_i32_0 : i32, i32
  }
  func.func @transform_2(%arg0: i32) -> (i32, i32) {
    %c0_i32 = arith.constant 0 : i32
    %c0_i32_0 = arith.constant 0 : i32
    return %arg0, %c0_i32 : i32, i32
  }
}

</mosaic_0001>

<bundles_post_ra>
// kernel: tpu_custom_call.1
= control target key start
LH: loop header
LB: loop body
LE: loop exit
PB: predicated region body
PF: predicated region fallthrough
CT: control target
= control target key end

     0   :  { %vm141_vm0 = vcmask 523264   ;;  %s1678_s0 = inlined_call_operand.vmem [shape: f32[8,64], index: 0, kind: input, shape index: {}]   ;;  %s1679_s1 = inlined_call_operand.vmem [shape: f32[1024,64], index: 1, kind: input, shape index: {}]   ;;  %s1680_s2 = inlined_call_operand.hbm [shape: f32[8,1024], index: 2, kind: output, shape index: {}]  }
   0x1   :  { %v44_v0 = vld [vmem:[%s1679_s1 + $0xf8] sm:$0xff]  ;;  %v43_v4 = vld [vmem:[%s1679_s1 + $0xf0] sm:$0xff]  ;;  %v42_v8 = vld [vmem:[%s1679_s1 + $0xe8] sm:$0xff] }
   0x2   :  { %v76_v1 = vld [vmem:[%s1679_s1 + $0x1f8] sm:$0xff]  ;;  %967 = vmatprep.subr.msk.mxu0 %vm141_vm0, %v44_v0  ;;  %v75_v5 = vld [vmem:[%s1679_s1 + $0x1f0] sm:$0xff]  ;;  %v74_v9 = vld [vmem:[%s1679_s1 + $0x1e8] sm:$0xff] }
   0x3   :  { %v28_v2 = vld [vmem:[%s1679_s1 + $0x78] sm:$0xff]  ;;  %1001 = vmatprep.subr.msk.mxu1 %vm141_vm0, %v76_v1  ;;  %v27_v6 = vld [vmem:[%s1679_s1 + $0x70] sm:$0xff]  ;;  %v26_v10 = vld [vmem:[%s1679_s1 + $0x68] sm:$0xff] }
   0x4   :  { %v60_v3 = vld [vmem:[%s1679_s1 + $0x178] sm:$0xff]  ;;  %968 = vmatpush3.xpose.msk.msra.mxu0 %vm141_vm0, %v28_v2  ;;  %v59_v7 = vld [vmem:[%s1679_s1 + $0x170] sm:$0xff]  ;;  %v58_v11 = vld [vmem:[%s1679_s1 + $0x168] sm:$0xff] }
   0x5   :  { %1002 = vmatpush3.xpose.msk.msra.mxu1 %vm141_vm0, %v60_v3  ;;  %969 = vmatprep.subr.msk.mxu0 %vm141_vm0, %v43_v4  ;;  %v41_v12 = vld [vmem:[%s1679_s1 + $0xe0] sm:$0xff]  ;;  %v40_v16 = vld [vmem:[%s1679_s1 + $0xd8] sm:$0xff]  ;;  %v39_v20 = vld [vmem:[%s1679_s1 + $0xd0] sm:$0xff] }
   0x6   :  { %1003 = vmatprep.subr.msk.mxu1 %vm141_vm0, %v75_v5  ;;  %v73_v13 = vld [vmem:[%s1679_s1 + $0x1e0] sm:$0xff]  ;;  %v72_v17 = vld [vmem:[%s1679_s1 + $0x1d8] sm:$0xff]  ;;  %v71_v21 = vld [vmem:[%s1679_s1 + $0x1d0] sm:$0xff] }
   0x7   :  { %v25_v14 = vld [vmem:[%s1679_s1 + $0x60] sm:$0xff]  ;;  %v24_v18 = vld [vmem:[%s1679_s1 + $0x58] sm:$0xff]  ;;  %v23_v22 = vld [vmem:[%s1679_s1 + $0x50] sm:$0xff] }
   0x8   :  { %970 = vmatpush3.xpose.msk.msra.mxu0 %vm141_vm0, %v27_v6  ;;  %v57_v15 = vld [vmem:[%s1679_s1 + $0x160] sm:$0xff]  ;;  %v56_v19 = vld [vmem:[%s1679_s1 + $0x158] sm:$0xff]  ;;  %v55_v23 = vld [vmem:[%s1679_s1 + $0x150] sm:$0xff] }
   0x9   :  { %1004 = vmatpush3.xpose.msk.msra.mxu1 %vm141_vm0, %v59_v7  ;;  %971 = vmatprep.subr.msk.mxu0 %vm141_vm0, %v42_v8  ;;  %v38_v24 = vld [vmem:[%s1679_s1 + $0xc8] sm:$0xff]  ;;  %v1245_v26 = vld [vmem:[%s1678_s0] sm:$0xff]  ;;  %v36_v33 = vld [vmem:[%s1679_s1 + $0xb8] sm:$0xff] }
   0xa   :  { %1005 = vmatprep.subr.msk.mxu1 %vm141_vm0, %v74_v9  ;;  %v70_v25 = vld [vmem:[%s1679_s1 + $0x1c8] sm:$0xff]  ;;  %v37_v29 = vld [vmem:[%s1679_s1 + $0xc0] sm:$0xff]  ;;  %999 = vmatprep.mubr.msk.f32.mxu0 %vm141_vm0, %v1245_v26  ;;  %v68_v34 = vld [vmem:[%s1679_s1 + $0x1b8] sm:$0xff] }
   0xb   :  { %v22_v27 = vld [vmem:[%s1679_s1 + $0x48] sm:$0xff]  ;;  %v69_v30 = vld [vmem:[%s1679_s1 + $0x1c0] sm:$0xff]  ;;  %1033 = vmatprep.mubr.msk.f32.mxu1 %vm141_vm0, %v1245_v26  ;;  %v20_v35 = vld [vmem:[%s1679_s1 + $0x38] sm:$0xff] }
   0xc   :  { %972 = vmatpush3.xpose.msk.msra.mxu0 %vm141_vm0, %v26_v10  ;;  %v54_v28 = vld [vmem:[%s1679_s1 + $0x148] sm:$0xff]  ;;  %v21_v31 = vld [vmem:[%s1679_s1 + $0x40] sm:$0xff]  ;;  %v52_v36 = vld [vmem:[%s1679_s1 + $0x138] sm:$0xff] }
   0xd   :  { %1006 = vmatpush3.xpose.msk.msra.mxu1 %vm141_vm0, %v58_v11  ;;  %973 = vmatprep.subr.msk.mxu0 %vm141_vm0, %v41_v12  ;;  %v53_v32 = vld [vmem:[%s1679_s1 + $0x140] sm:$0xff]  ;;  %v35_v37 = vld [vmem:[%s1679_s1 + $0xb0] sm:$0xff]  ;;  %v34_v41 = vld [vmem:[%s1679_s1 + $0xa8] sm:$0xff] }
   0xe   :  { %1007 = vmatprep.subr.msk.mxu1 %vm141_vm0, %v73_v13  ;;  %v67_v38 = vld [vmem:[%s1679_s1 + $0x1b0] sm:$0xff]  ;;  %v66_v42 = vld [vmem:[%s1679_s1 + $0x1a8] sm:$0xff]  ;;  %v33_v45 = vld [vmem:[%s1679_s1 + $0xa0] sm:$0xff] }
   0xf   :  { %v19_v39 = vld [vmem:[%s1679_s1 + $0x30] sm:$0xff]  ;;  %v18_v43 = vld [vmem:[%s1679_s1 + $0x28] sm:$0xff]  ;;  %v65_v46 = vld [vmem:[%s1679_s1 + $0x1a0] sm:$0xff] }
  0x10   :  { %974 = vmatpush3.xpose.msk.msra.mxu0 %vm141_vm0, %v25_v14  ;;  %v51_v40 = vld [vmem:[%s1679_s1 + $0x130] sm:$0xff]  ;;  %v50_v44 = vld [vmem:[%s1679_s1 + $0x128] sm:$0xff]  ;;  %v17_v47 = vld [vmem:[%s1679_s1 + $0x20] sm:$0xff] }
  0x11   :  { %1008 = vmatpush3.xpose.msk.msra.mxu1 %vm141_vm0, %v57_v15  ;;  %975 = vmatprep.subr.msk.mxu0 %vm141_vm0, %v40_v16  ;;  %v49_v48 = vld [vmem:[%s1679_s1 + $0x120] sm:$0xff] }
  0x12   :  { %1009 = vmatprep.subr.msk.mxu1 %vm141_vm0, %v72_v17 }
  0x14   :  { %976 = vmatpush3.xpose.msk.msra.mxu0 %vm141_vm0, %v24_v18 }
  0x15   :  { %1010 = vmatpush3.xpose.msk.msra.mxu1 %vm141_vm0, %v56_v19  ;;  %977 = vmatprep.subr.msk.mxu0 %vm141_vm0, %v39_v20 }
  0x16   :  { %1011 = vmatprep.subr.msk.mxu1 %vm141_vm0, %v71_v21 }
  0x18   :  { %978 = vmatpush3.xpose.msk.msra.mxu0 %vm141_vm0, %v23_v22 }
  0x19   :  { %1012 = vmatpush3.xpose.msk.msra.mxu1 %vm141_vm0, %v55_v23  ;;  %979 = vmatprep.subr.msk.mxu0 %vm141_vm0, %v38_v24 }
  0x1a   :  { %1013 = vmatprep.subr.msk.mxu1 %vm141_vm0, %v70_v25 }
  0x1c   :  { %980 = vmatpush3.xpose.msk.msra.mxu0 %vm141_vm0, %v22_v27 }
  0x1d   :  { %1014 = vmatpush3.xpose.msk.msra.mxu1 %vm141_vm0, %v54_v28  ;;  %981 = vmatprep.subr.msk.mxu0 %vm141_vm0, %v37_v29 }
  0x1e   :  { %1015 = vmatprep.subr.msk.mxu1 %vm141_vm0, %v69_v30 }
  0x20   :  { %982 = vmatpush3.xpose.msk.msra.mxu0 %vm141_vm0, %v21_v31 }
  0x21   :  { %1016 = vmatpush3.xpose.msk.msra.mxu1 %vm141_vm0, %v53_v32  ;;  %983 = vmatprep.subr.msk.mxu0 %vm141_vm0, %v36_v33 }
  0x22   :  { %1017 = vmatprep.subr.msk.mxu1 %vm141_vm0, %v68_v34 }
  0x24   :  { %984 = vmatpush3.xpose.msk.msra.mxu0 %vm141_vm0, %v20_v35 }
  0x25   :  { %1018 = vmatpush3.xpose.msk.msra.mxu1 %vm141_vm0, %v52_v36  ;;  %985 = vmatprep.subr.msk.mxu0 %vm141_vm0, %v35_v37 }
  0x26   :  { %1019 = vmatprep.subr.msk.mxu1 %vm141_vm0, %v67_v38 }
  0x28   :  { %986 = vmatpush3.xpose.msk.msra.mxu0 %vm141_vm0, %v19_v39 }
  0x29   :  { %1020 = vmatpush3.xpose.msk.msra.mxu1 %vm141_vm0, %v51_v40  ;;  %987 = vmatprep.subr.msk.mxu0 %vm141_vm0, %v34_v41 }
  0x2a   :  { %1021 = vmatprep.subr.msk.mxu1 %vm141_vm0, %v66_v42 }
  0x2c   :  { %988 = vmatpush3.xpose.msk.msra.mxu0 %vm141_vm0, %v18_v43 }
  0x2d   :  { %1022 = vmatpush3.xpose.msk.msra.mxu1 %vm141_vm0, %v50_v44  ;;  %989 = vmatprep.subr.msk.mxu0 %vm141_vm0, %v33_v45 }
  0x2e   :  { %1023 = vmatprep.subr.msk.mxu1 %vm141_vm0, %v65_v46 }
  0x2f   :  { %7 = vsyncpa [#allocation3], 0  ;;  %v32_v49 = vld [vmem:[%s1679_s1 + $0x98] sm:$0xff]  ;;  %v31_v53 = vld [vmem:[%s1679_s1 + $0x90] sm:$0xff]  ;;  %s1126_s8 = smov [#allocation2]  }
  0x30   :  { %v64_v50 = vld [vmem:[%s1679_s1 + $0x198] sm:$0xff]  ;;  %990 = vmatpush3.xpose.msk.msra.mxu0 %vm141_vm0, %v17_v47  ;;  %v63_v54 = vld [vmem:[%s1679_s1 + $0x190] sm:$0xff]  ;;  %v30_v57 = vld [vmem:[%s1679_s1 + $0x88] sm:$0xff] }
  0x31   :  { %1024 = vmatpush3.xpose.msk.msra.mxu1 %vm141_vm0, %v49_v48  ;;  %991 = vmatprep.subr.msk.mxu0 %vm141_vm0, %v32_v49  ;;  %v16_v51 = vld [vmem:[%s1679_s1 + $0x18] sm:$0xff]  ;;  %v15_v55 = vld [vmem:[%s1679_s1 + $0x10] sm:$0xff]  ;;  %v62_v58 = vld [vmem:[%s1679_s1 + $0x188] sm:$0xff] }
  0x32   :  { %1025 = vmatprep.subr.msk.mxu1 %vm141_vm0, %v64_v50  ;;  %v48_v52 = vld [vmem:[%s1679_s1 + $0x118] sm:$0xff]  ;;  %v47_v56 = vld [vmem:[%s1679_s1 + $0x110] sm:$0xff]  ;;  %v14_v59 = vld [vmem:[%s1679_s1 + $0x8] sm:$0xff] }
  0x33   :  { %v46_v60 = vld [vmem:[%s1679_s1 + $0x108] sm:$0xff]  ;;  %v29_v61 = vld [vmem:[%s1679_s1 + $0x80] sm:$0xff]  ;;  %v108_v1 = vld [vmem:[%s1679_s1 + $0x2f8] sm:$0xff] }
  0x34   :  { %992 = vmatpush3.xpose.msk.msra.mxu0 %vm141_vm0, %v16_v51  ;;  %v61_v62 = vld [vmem:[%s1679_s1 + $0x180] sm:$0xff]  ;;  %v140_v2 = vld [vmem:[%s1679_s1 + $0x3f8] sm:$0xff]  ;;  %v107_v5 = vld [vmem:[%s1679_s1 + $0x2f0] sm:$0xff] }
  0x35   :  { %1026 = vmatpush3.xpose.msk.msra.mxu1 %vm141_vm0, %v48_v52  ;;  %993 = vmatprep.subr.msk.mxu0 %vm141_vm0, %v31_v53  ;;  %v13_v63 = vld [vmem:[%s1679_s1] sm:$0xff]  ;;  %v92_v3 = vld [vmem:[%s1679_s1 + $0x278] sm:$0xff]  ;;  %v139_v6 = vld [vmem:[%s1679_s1 + $0x3f0] sm:$0xff] }
  0x36   :  { %1027 = vmatprep.subr.msk.mxu1 %vm141_vm0, %v63_v54  ;;  %v45_v0 = vld [vmem:[%s1679_s1 + $0x100] sm:$0xff]  ;;  %v124_v4 = vld [vmem:[%s1679_s1 + $0x378] sm:$0xff]  ;;  %v91_v7 = vld [vmem:[%s1679_s1 + $0x270] sm:$0xff] }
  0x37   :  { %v123_v8 = vld [vmem:[%s1679_s1 + $0x370] sm:$0xff]  ;;  %v106_v9 = vld [vmem:[%s1679_s1 + $0x2e8] sm:$0xff]  ;;  %v105_v13 = vld [vmem:[%s1679_s1 + $0x2e0] sm:$0xff] }
  0x38   :  { %994 = vmatpush3.xpose.msk.msra.mxu0 %vm141_vm0, %v15_v55  ;;  %v138_v10 = vld [vmem:[%s1679_s1 + $0x3e8] sm:$0xff]  ;;  %v137_v14 = vld [vmem:[%s1679_s1 + $0x3e0] sm:$0xff]  ;;  %v104_v17 = vld [vmem:[%s1679_s1 + $0x2d8] sm:$0xff] }
  0x39   :  { %1028 = vmatpush3.xpose.msk.msra.mxu1 %vm141_vm0, %v47_v56  ;;  %995 = vmatprep.subr.msk.mxu0 %vm141_vm0, %v30_v57  ;;  %v90_v11 = vld [vmem:[%s1679_s1 + $0x268] sm:$0xff]  ;;  %v89_v15 = vld [vmem:[%s1679_s1 + $0x260] sm:$0xff]  ;;  %v136_v18 = vld [vmem:[%s1679_s1 + $0x3d8] sm:$0xff] }
  0x3a   :  { %1029 = vmatprep.subr.msk.mxu1 %vm141_vm0, %v62_v58  ;;  %v122_v12 = vld [vmem:[%s1679_s1 + $0x368] sm:$0xff]  ;;  %v121_v16 = vld [vmem:[%s1679_s1 + $0x360] sm:$0xff]  ;;  %v88_v19 = vld [vmem:[%s1679_s1 + $0x258] sm:$0xff] }
  0x3b   :  { %v120_v20 = vld [vmem:[%s1679_s1 + $0x358] sm:$0xff]  ;;  %v103_v21 = vld [vmem:[%s1679_s1 + $0x2d0] sm:$0xff]  ;;  %v102_v25 = vld [vmem:[%s1679_s1 + $0x2c8] sm:$0xff] }
  0x3c   :  { %996 = vmatpush3.xpose.msk.msra.mxu0 %vm141_vm0, %v14_v59  ;;  %v135_v22 = vld [vmem:[%s1679_s1 + $0x3d0] sm:$0xff]  ;;  %v134_v27 = vld [vmem:[%s1679_s1 + $0x3c8] sm:$0xff]  ;;  %v101_v30 = vld [vmem:[%s1679_s1 + $0x2c0] sm:$0xff] }
  0x3d   :  { %1030 = vmatpush3.xpose.msk.msra.mxu1 %vm141_vm0, %v46_v60  ;;  %997 = vmatprep.subr.msk.mxu0 %vm141_vm0, %v29_v61  ;;  %v87_v23 = vld [vmem:[%s1679_s1 + $0x250] sm:$0xff]  ;;  %v86_v28 = vld [vmem:[%s1679_s1 + $0x248] sm:$0xff]  ;;  %v133_v31 = vld [vmem:[%s1679_s1 + $0x3c0] sm:$0xff] }
  0x3e   :  { %1031 = vmatprep.subr.msk.mxu1 %vm141_vm0, %v61_v62  ;;  %v119_v24 = vld [vmem:[%s1679_s1 + $0x350] sm:$0xff]  ;;  %v118_v29 = vld [vmem:[%s1679_s1 + $0x348] sm:$0xff]  ;;  %v85_v32 = vld [vmem:[%s1679_s1 + $0x240] sm:$0xff] }
  0x3f   :  { %v117_v33 = vld [vmem:[%s1679_s1 + $0x340] sm:$0xff]  ;;  %v100_v34 = vld [vmem:[%s1679_s1 + $0x2b8] sm:$0xff]  ;;  %v99_v38 = vld [vmem:[%s1679_s1 + $0x2b0] sm:$0xff] }
  0x40   :  { %998 = vmatpush3.xpose.msk.msra.mxu0 %vm141_vm0, %v13_v63  ;;  %v132_v35 = vld [vmem:[%s1679_s1 + $0x3b8] sm:$0xff]  ;;  %v131_v39 = vld [vmem:[%s1679_s1 + $0x3b0] sm:$0xff]  ;;  %v98_v42 = vld [vmem:[%s1679_s1 + $0x2a8] sm:$0xff] }
  0x41   :  { %1032 = vmatpush3.xpose.msk.msra.mxu1 %vm141_vm0, %v45_v0  ;;  %1035 = vmatprep.subr.msk.mxu0 %vm141_vm0, %v108_v1  ;;  %v84_v36 = vld [vmem:[%s1679_s1 + $0x238] sm:$0xff]  ;;  %v83_v40 = vld [vmem:[%s1679_s1 + $0x230] sm:$0xff]  ;;  %v130_v43 = vld [vmem:[%s1679_s1 + $0x3a8] sm:$0xff] }
  0x42   :  { %1069 = vmatprep.subr.msk.mxu1 %vm141_vm0, %v140_v2  ;;  %v116_v37 = vld [vmem:[%s1679_s1 + $0x338] sm:$0xff]  ;;  %v115_v41 = vld [vmem:[%s1679_s1 + $0x330] sm:$0xff]  ;;  %v82_v44 = vld [vmem:[%s1679_s1 + $0x228] sm:$0xff] }
  0x43   :  { %1000 = vmatmul.mubr.msk.f32.vlgmr.msra.gmra.mxu0 %vm141_vm0, %v1245_v26  ;;  %v114_v45 = vld [vmem:[%s1679_s1 + $0x328] sm:$0xff]  ;;  %v97_v46 = vld [vmem:[%s1679_s1 + $0x2a0] sm:$0xff]  ;;  %v96_v50 = vld [vmem:[%s1679_s1 + $0x298] sm:$0xff] }
  0x44   :  { %1034 = vmatmul.mubr.msk.f32.vlgmr.msra.gmra.mxu1 %vm141_vm0, %v1245_v26  ;;  %1036 = vmatpush3.xpose.msk.msra.mxu0 %vm141_vm0, %v92_v3  ;;  %v129_v47 = vld [vmem:[%s1679_s1 + $0x3a0] sm:$0xff]  ;;  %v128_v51 = vld [vmem:[%s1679_s1 + $0x398] sm:$0xff]  ;;  %v95_v54 = vld [vmem:[%s1679_s1 + $0x290] sm:$0xff] }
  0x45   :  { %1070 = vmatpush3.xpose.msk.msra.mxu1 %vm141_vm0, %v124_v4  ;;  %1037 = vmatprep.subr.msk.mxu0 %vm141_vm0, %v107_v5  ;;  %v81_v48 = vld [vmem:[%s1679_s1 + $0x220] sm:$0xff]  ;;  %v80_v52 = vld [vmem:[%s1679_s1 + $0x218] sm:$0xff]  ;;  %v127_v55 = vld [vmem:[%s1679_s1 + $0x390] sm:$0xff] }
  0x46   :  { %1071 = vmatprep.subr.msk.mxu1 %vm141_vm0, %v139_v6  ;;  %1067 = vmatprep.mubr.msk.f32.mxu0 %vm141_vm0, %v1245_v26  ;;  %v113_v49 = vld [vmem:[%s1679_s1 + $0x320] sm:$0xff]  ;;  %v112_v53 = vld [vmem:[%s1679_s1 + $0x318] sm:$0xff]  ;;  %v79_v56 = vld [vmem:[%s1679_s1 + $0x210] sm:$0xff] }
  0x47   :  { %1101 = vmatprep.mubr.msk.f32.mxu1 %vm141_vm0, %v1245_v26  ;;  %v111_v57 = vld [vmem:[%s1679_s1 + $0x310] sm:$0xff]  ;;  %v94_v58 = vld [vmem:[%s1679_s1 + $0x288] sm:$0xff]  ;;  %v93_v62 = vld [vmem:[%s1679_s1 + $0x280] sm:$0xff] }
  0x48   :  { %1038 = vmatpush3.xpose.msk.msra.mxu0 %vm141_vm0, %v91_v7  ;;  %v126_v59 = vld [vmem:[%s1679_s1 + $0x388] sm:$0xff]  ;;  %v125_v63 = vld [vmem:[%s1679_s1 + $0x380] sm:$0xff] }
  0x49   :  { %1072 = vmatpush3.xpose.msk.msra.mxu1 %vm141_vm0, %v123_v8  ;;  %1039 = vmatprep.subr.msk.mxu0 %vm141_vm0, %v106_v9  ;;  %v78_v60 = vld [vmem:[%s1679_s1 + $0x208] sm:$0xff]  ;;  %v77_v0 = vld [vmem:[%s1679_s1 + $0x200] sm:$0xff] }
  0x4a   :  { %1073 = vmatprep.subr.msk.mxu1 %vm141_vm0, %v138_v10  ;;  %v110_v61 = vld [vmem:[%s1679_s1 + $0x308] sm:$0xff]  ;;  %v109_v1 = vld [vmem:[%s1679_s1 + $0x300] sm:$0xff]  ;;  %s827_s1 = sshll.u32 %s1126_s8, 4  ;;  %s828_s1 = int_to_ptr.vmem [resolvable:$true] %s827_s1 }
  0x4b   :  { %s1104_s9 = scalar_lea.vmem %s828_s1, 1024  ;;  %p1109_p1 = scmp.lt.s32.totalorder %s828_s1, %s828_s1 }
  0x4c   :  { %1040 = vmatpush3.xpose.msk.msra.mxu0 %vm141_vm0, %v90_v11  ;;  %p1105_p0 = scmp.ne.s32.totalorder %s828_s1, %s1104_s9  ;;  %p1110_p2 = scmp.lt.s32.totalorder %s1104_s9, %s1104_s9 }
  0x4d   :  { %1074 = vmatpush3.xpose.msk.msra.mxu1 %vm141_vm0, %v122_v12  ;;  %1041 = vmatprep.subr.msk.mxu0 %vm141_vm0, %v105_v13 }
  0x4e   :  { %1075 = vmatprep.subr.msk.mxu1 %vm141_vm0, %v137_v14  ;;  %p1111_p3 = por %p1110_p2, %p1109_p1 }
  0x50   :  { %1042 = vmatpush3.xpose.msk.msra.mxu0 %vm141_vm0, %v89_v15  ;;  %p1112_p4 = pnand %p1111_p3, %p1105_p0 }
  0x51   :  { %1076 = vmatpush3.xpose.msk.msra.mxu1 %vm141_vm0, %v121_v16  ;;  %1043 = vmatprep.subr.msk.mxu0 %vm141_vm0, %v104_v17 }
  0x52   :  { %1077 = vmatprep.subr.msk.mxu1 %vm141_vm0, %v136_v18 }
  0x54   :  { %1044 = vmatpush3.xpose.msk.msra.mxu0 %vm141_vm0, %v88_v19 }
  0x55   :  { %1078 = vmatpush3.xpose.msk.msra.mxu1 %vm141_vm0, %v120_v20  ;;  %1045 = vmatprep.subr.msk.mxu0 %vm141_vm0, %v103_v21 }
  0x56   :  { %1079 = vmatprep.subr.msk.mxu1 %vm141_vm0, %v135_v22 }
  0x58   :  { %1046 = vmatpush3.xpose.msk.msra.mxu0 %vm141_vm0, %v87_v23 }
  0x59   :  { %1080 = vmatpush3.xpose.msk.msra.mxu1 %vm141_vm0, %v119_v24  ;;  %1047 = vmatprep.subr.msk.mxu0 %vm141_vm0, %v102_v25 }
  0x5a   :  { %1081 = vmatprep.subr.msk.mxu1 %vm141_vm0, %v134_v27 }
  0x5c   :  { %1048 = vmatpush3.xpose.msk.msra.mxu0 %vm141_vm0, %v86_v28 }
  0x5d   :  { %1082 = vmatpush3.xpose.msk.msra.mxu1 %vm141_vm0, %v118_v29  ;;  %1049 = vmatprep.subr.msk.mxu0 %vm141_vm0, %v101_v30 }
  0x5e   :  { %1083 = vmatprep.subr.msk.mxu1 %vm141_vm0, %v133_v31 }
  0x60   :  { %1050 = vmatpush3.xpose.msk.msra.mxu0 %vm141_vm0, %v85_v32 }
  0x61   :  { %1084 = vmatpush3.xpose.msk.msra.mxu1 %vm141_vm0, %v117_v33  ;;  %1051 = vmatprep.subr.msk.mxu0 %vm141_vm0, %v100_v34 }
  0x62   :  { %1085 = vmatprep.subr.msk.mxu1 %vm141_vm0, %v132_v35 }
  0x64   :  { %1052 = vmatpush3.xpose.msk.msra.mxu0 %vm141_vm0, %v84_v36 }
  0x65   :  { %1086 = vmatpush3.xpose.msk.msra.mxu1 %vm141_vm0, %v116_v37  ;;  %1053 = vmatprep.subr.msk.mxu0 %vm141_vm0, %v99_v38 }
  0x66   :  { %1087 = vmatprep.subr.msk.mxu1 %vm141_vm0, %v131_v39 }
  0x68   :  { %1054 = vmatpush3.xpose.msk.msra.mxu0 %vm141_vm0, %v83_v40 }
  0x69   :  { %1088 = vmatpush3.xpose.msk.msra.mxu1 %vm141_vm0, %v115_v41  ;;  %1055 = vmatprep.subr.msk.mxu0 %vm141_vm0, %v98_v42 }
  0x6a   :  { %1089 = vmatprep.subr.msk.mxu1 %vm141_vm0, %v130_v43 }
  0x6c   :  { %1056 = vmatpush3.xpose.msk.msra.mxu0 %vm141_vm0, %v82_v44 }
  0x6d   :  { %1090 = vmatpush3.xpose.msk.msra.mxu1 %vm141_vm0, %v114_v45  ;;  %1057 = vmatprep.subr.msk.mxu0 %vm141_vm0, %v97_v46 }
  0x6e   :  { %1091 = vmatprep.subr.msk.mxu1 %vm141_vm0, %v129_v47 }
  0x70   :  { %1058 = vmatpush3.xpose.msk.msra.mxu0 %vm141_vm0, %v81_v48 }
  0x71   :  { %1092 = vmatpush3.xpose.msk.msra.mxu1 %vm141_vm0, %v113_v49  ;;  %1059 = vmatprep.subr.msk.mxu0 %vm141_vm0, %v96_v50 }
  0x72   :  { %1093 = vmatprep.subr.msk.mxu1 %vm141_vm0, %v128_v51 }
  0x74   :  { %1060 = vmatpush3.xpose.msk.msra.mxu0 %vm141_vm0, %v80_v52 }
  0x75   :  { %1094 = vmatpush3.xpose.msk.msra.mxu1 %vm141_vm0, %v112_v53  ;;  %1061 = vmatprep.subr.msk.mxu0 %vm141_vm0, %v95_v54 }
  0x76   :  { %1095 = vmatprep.subr.msk.mxu1 %vm141_vm0, %v127_v55 }
  0x78   :  { %1062 = vmatpush3.xpose.msk.msra.mxu0 %vm141_vm0, %v79_v56 }
  0x79   :  { %1096 = vmatpush3.xpose.msk.msra.mxu1 %vm141_vm0, %v111_v57  ;;  %1063 = vmatprep.subr.msk.mxu0 %vm141_vm0, %v94_v58 }
  0x7a   :  { %1097 = vmatprep.subr.msk.mxu1 %vm141_vm0, %v126_v59 }
  0x7c   :  { %1064 = vmatpush3.xpose.msk.msra.mxu0 %vm141_vm0, %v78_v60 }
  0x7d   :  { %1098 = vmatpush3.xpose.msk.msra.mxu1 %vm141_vm0, %v110_v61  ;;  %1065 = vmatprep.subr.msk.mxu0 %vm141_vm0, %v93_v62 }
  0x7e   :  { %1099 = vmatprep.subr.msk.mxu1 %vm141_vm0, %v125_v63 }
  0x80   :  { %1066 = vmatpush3.xpose.msk.msra.mxu0 %vm141_vm0, %v77_v0 }
  0x81   :  { %1100 = vmatpush3.xpose.msk.msra.mxu1 %vm141_vm0, %v109_v1 }
  0x83   :  { %1068 = vmatmul.mubr.msk.f32.vlgmr.msra.gmra.mxu0 %vm141_vm0, %v1245_v26 }
  0x84   :  { %1102 = vmatmul.mubr.msk.f32.vlgmr.msra.gmra.mxu1 %vm141_vm0, %v1245_v26 }
 0x103   :  { %v595_v2 = vpop.f32.mrf.mxu0 }
 0x104   :  { %v666_v3 = vpop.f32.mrf.mxu1  ;;  %813 = vst [vmem:[#allocation2] sm:$0xff] %v595_v2 }
 0x105   :  { %815 = vst [vmem:[#allocation2 + $0x10] sm:$0xff] %v666_v3  ;;  %v597_v4 = vpop.f32.mrf.mxu0 }
 0x106   :  { %v668_v5 = vpop.f32.mrf.mxu1  ;;  %814 = vst [vmem:[#allocation2 + $0x8] sm:$0xff] %v597_v4 }
 0x107   :  { %816 = vst [vmem:[#allocation2 + $0x18] sm:$0xff] %v668_v5 }
 0x143   :  { %v737_v6 = vpop.f32.mrf.mxu0 }
 0x144   :  { %v808_v7 = vpop.f32.mrf.mxu1  ;;  %817 = vst [vmem:[#allocation2 + $0x20] sm:$0xff] %v737_v6 }
 0x145   :  { %819 = vst [vmem:[#allocation2 + $0x30] sm:$0xff] %v808_v7  ;;  %v739_v8 = vpop.f32.mrf.mxu0 }
 0x146   :  { %v810_v9 = vpop.f32.mrf.mxu1  ;;  %818 = vst [vmem:[#allocation2 + $0x28] sm:$0xff] %v739_v8 }
 0x147   :  { %820 = vst [vmem:[#allocation2 + $0x38] sm:$0xff] %v810_v9 }
 0x148   :  { %1115 = shalt.err (!%p1112_p4)
}
 0x149   :  { %830 = dma.vmem_to_hbm [thread:$0]  %s828_s1, 1024, %s1680_s2, [#allocation3]  }
 0x14a   :  { %1124 = dma.done.wait [#allocation3], 1024  }
 0x14b   :  { %1125 = vsyncadd [#allocation3], 4294966272 }
 0x14c   :  { %834 = vsyncpa [#allocation3], 1 }

</bundles_post_ra>
